<compile_context>
chip_gen: v6e
topology: v6e:2x2x1
jax: 0.10.0
libtpu: 0.0.40
codegen_flags: <defaults>
</compile_context>

<pallas_src>
import jax
import jax.numpy as jnp
from jax.experimental import pallas as pl
from jax.experimental.pallas import tpu as pltpu

INPUT_SIZE = 600
H1, H2, H3, OUT = 512, 256, 128, 1
BN_EPS = 1e-5


def _round_up(x, m):
    return ((x + m - 1) // m) * m


# ----------------------------- kernel ---------------------------------------
def mlp_kernel(x_ref,
               w1_ref, b1_ref,
               w2_ref, b2_ref,
               w3_ref, b3_ref,
               w4_ref, b4_ref,
               o_ref):
    """Fused 600->512->256->128->1 MLP (BN pre-folded, dropout = identity)."""
    # layer 1: cast fp32 input to bf16 (hidden under MXU), fc1(+bn1) -> relu
    x = x_ref[...].astype(jnp.bfloat16)
    h = jnp.dot(x, w1_ref[...], preferred_element_type=jnp.float32)
    h = jnp.maximum(h + b1_ref[...], 0.0)

    # layer 2: fc2 (+ folded bn2) -> relu
    h = jnp.dot(h.astype(jnp.bfloat16), w2_ref[...],
                preferred_element_type=jnp.float32)
    h = jnp.maximum(h + b2_ref[...], 0.0)

    # layer 3: fc3 (+ folded bn3) -> relu
    h = jnp.dot(h.astype(jnp.bfloat16), w3_ref[...],
                preferred_element_type=jnp.float32)
    h = jnp.maximum(h + b3_ref[...], 0.0)

    # layer 4: fc4 as VPU multiply + XLU cross-lane reduce (fp32), no thin MXU op
    out = jnp.sum(h * w4_ref[...], axis=-1, keepdims=True) + b4_ref[...]
    o_ref[...] = out.astype(o_ref.dtype)


# ------------------------- one-time preprocessing ----------------------------
def prepare_params(raw, eps=BN_EPS, weight_dtype=jnp.bfloat16):
    """Fold eval-mode BatchNorm into the Linear layers, transpose weights to
    [in, out], cast the big weights to bf16. Run ONCE (not per forward)."""
    def fold(w, b, gamma, beta, mean, var):
        scale = gamma / jnp.sqrt(var + eps)          # (out,)
        shift = beta - mean * scale
        w_t = w.T * scale[None, :]                   # [in, out], BN folded
        b_f = b * scale + shift
        return w_t, b_f

    w1, b1 = fold(raw["w1"], raw["b1"], raw["g1"], raw["be1"], raw["m1"], raw["v1"])
    w2, b2 = fold(raw["w2"], raw["b2"], raw["g2"], raw["be2"], raw["m2"], raw["v2"])
    w3, b3 = fold(raw["w3"], raw["b3"], raw["g3"], raw["be3"], raw["m3"], raw["v3"])

    return dict(
        w1=w1.astype(weight_dtype), b1=b1[None, :].astype(jnp.float32),
        w2=w2.astype(weight_dtype), b2=b2[None, :].astype(jnp.float32),
        w3=w3.astype(weight_dtype), b3=b3[None, :].astype(jnp.float32),
        # fc4 is computed on the VPU: keep it fp32 as a (1, H3) row.
        w4=raw["w4"].reshape(1, H3).astype(jnp.float32),
        b4=raw["b4"].reshape(1, OUT).astype(jnp.float32),
    )


# ------------------------------ wrapper --------------------------------------
def robust_gap_predictor(x, prepared, block_batch=1024):
    """Forward pass (eval mode). x: (B, 600) float32 -> (B, 1) float32."""
    B = x.shape[0]
    if B == 0:
        return jnp.zeros((0, OUT), jnp.float32)

    # Tile: multiple of 8 sublanes, >= 2 grid steps whenever B >= 16 (so the
    # "parallel" batch axis shards over both v7x TensorCores), capped at
    # block_batch rows/step to bound VMEM and amortize per-step overhead.
    tb = min(block_batch, max(8, _round_up(pl.cdiv(B, 2), 8)))
    grid = pl.cdiv(B, tb)          # ragged last block handled by Pallas

    def rep(i):                    # weights/biases: same block every grid step
        return (0, 0)

    # Constant index maps keep weights VMEM-resident (no per-step re-DMA).
    weight_specs = [
        pl.BlockSpec((INPUT_SIZE, H1), rep), pl.BlockSpec((1, H1), rep),
        pl.BlockSpec((H1, H2), rep),         pl.BlockSpec((1, H2), rep),
        pl.BlockSpec((H2, H3), rep),         pl.BlockSpec((1, H3), rep),
        pl.BlockSpec((1, H3), rep),          pl.BlockSpec((1, OUT), rep),
    ]

    flops = 2 * B * (INPUT_SIZE * H1 + H1 * H2 + H2 * H3 + H3 * OUT)
    weight_bytes = 2 * (INPUT_SIZE * H1 + H1 * H2 + H2 * H3) + 4 * (H3 + OUT)
    bytes_accessed = weight_bytes + B * INPUT_SIZE * 4 + B * OUT * 4

    # TODO(synk): output last-dim is 1 (masked vst); a sublane->lane transpose
    # to a (1, tb) lane-dense out block is possible but needs a measured win.
    out = pl.pallas_call(
        mlp_kernel,
        out_shape=jax.ShapeDtypeStruct((B, OUT), jnp.float32),
        grid_spec=pltpu.PrefetchScalarGridSpec(
            num_scalar_prefetch=0,
            grid=(grid,),
            in_specs=[pl.BlockSpec((tb, INPUT_SIZE), lambda i: (i, 0))]
                     + weight_specs,
            out_specs=pl.BlockSpec((tb, OUT), lambda i: (i, 0)),
        ),
        compiler_params=pltpu.CompilerParams(
            dimension_semantics=("parallel",),   # v7x: shard batch over 2 TCs
            vmem_limit_bytes=32 << 20,
        ),
        cost_estimate=pl.CostEstimate(
            flops=flops, transcendentals=0, bytes_accessed=bytes_accessed),
    )(x,
      prepared["w1"], prepared["b1"],
      prepared["w2"], prepared["b2"],
      prepared["w3"], prepared["b3"],
      prepared["w4"], prepared["b4"])

    return out


# ----------------------------- references ------------------------------------
def reference_forward_fp32(x, raw, eps=BN_EPS):
    """Pure-JAX fp32 reference matching the PyTorch eval-mode forward."""
    def bn(z, g, b, m, v):
        return (z - m) / jnp.sqrt(v + eps) * g + b

    h = jax.nn.relu(bn(x @ raw["w1"].T + raw["b1"],
                       raw["g1"], raw["be1"], raw["m1"], raw["v1"]))
    h = jax.nn.relu(bn(h @ raw["w2"].T + raw["b2"],
                       raw["g2"], raw["be2"], raw["m2"], raw["v2"]))
    h = jax.nn.relu(bn(h @ raw["w3"].T + raw["b3"],
                       raw["g3"], raw["be3"], raw["m3"], raw["v3"]))
    return h @ raw["w4"].T + raw["b4"]


def reference_forward_prepared(x, prepared):
    """Same math as the kernel (bf16 operands, fp32 accumulation) in pure JAX."""
    xb = x.astype(jnp.bfloat16)
    h = jnp.dot(xb, prepared["w1"], preferred_element_type=jnp.float32)
    h = jax.nn.relu(h + prepared["b1"])
    h = jnp.dot(h.astype(jnp.bfloat16), prepared["w2"],
                preferred_element_type=jnp.float32)
    h = jax.nn.relu(h + prepared["b2"])
    h = jnp.dot(h.astype(jnp.bfloat16), prepared["w3"],
                preferred_element_type=jnp.float32)
    h = jax.nn.relu(h + prepared["b3"])
    return jnp.sum(h * prepared["w4"], axis=-1, keepdims=True) + prepared["b4"]


# ------------------------------ params init ----------------------------------
def init_params(key, input_size=INPUT_SIZE):
    dims = [(H1, input_size), (H2, H1), (H3, H2), (OUT, H3)]
    params = {}
    keys = jax.random.split(key, 16)
    ki = iter(range(16))
    for li, (dout, din) in enumerate(dims, start=1):
        bound = 1.0 / jnp.sqrt(din)
        params[f"w{li}"] = jax.random.uniform(
            keys[next(ki)], (dout, din), jnp.float32, -bound, bound)
        params[f"b{li}"] = jax.random.uniform(
            keys[next(ki)], (dout,), jnp.float32, -bound, bound)
    for li, d in zip((1, 2, 3), (H1, H2, H3)):
        params[f"g{li}"] = 1.0 + 0.1 * jax.random.normal(
            keys[next(ki)], (d,), jnp.float32)
        params[f"be{li}"] = 0.05 * jax.random.normal(
            keys[next(ki)], (d,), jnp.float32)
        params[f"m{li}"] = 0.1 * jnp.sin(jnp.arange(d, dtype=jnp.float32))
        params[f"v{li}"] = 1.0 + 0.2 * jnp.cos(
            jnp.arange(d, dtype=jnp.float32)) ** 2
    return params


if __name__ == "__main__":
    key = jax.random.PRNGKey(0)
    pkey, xkey, x2key = jax.random.split(key, 3)

    raw_params = init_params(pkey)
    prepared = prepare_params(raw_params)          # one-time preprocessing

    # TODO(synk): nn.Dropout is stochastic only in training mode; eval-mode
    # (identity) semantics are implemented here.

    # --- small batch (single grid step, tb = 8) ---
    B = 8
    x = jax.random.normal(xkey, (B, INPUT_SIZE), jnp.float32)
    out = jax.block_until_ready(robust_gap_predictor(x, prepared))
    assert out.shape == (B, 1), out.shape

    ref_bits = reference_forward_prepared(x, prepared)       # same precision
    assert jnp.allclose(out, ref_bits, atol=1e-3, rtol=1e-3), (
        float(jnp.max(jnp.abs(out - ref_bits))))

    ref_fp32 = reference_forward_fp32(x, raw_params)          # module semantics
    assert jnp.allclose(out, ref_fp32, atol=3e-2, rtol=3e-2), (
        float(jnp.max(jnp.abs(out - ref_fp32))))

    # --- larger batch: 2 grid steps (tb=104) + ragged last block, no padding --
    B2 = 200
    x2 = jax.random.normal(x2key, (B2, INPUT_SIZE), jnp.float32)
    out2 = jax.block_until_ready(robust_gap_predictor(x2, prepared))
    assert out2.shape == (B2, 1), out2.shape
    ref2 = reference_forward_prepared(x2, prepared)
    assert jnp.allclose(out2, ref2, atol=1e-3, rtol=1e-3), (
        float(jnp.max(jnp.abs(out2 - ref2))))

    print("KERNEL_OK")
</pallas_src>

<mosaic_0001>
module attributes {stable_mosaic.version = 11 : i64} {
  func.func @mlp_kernel(%arg0: i32, %arg1: memref<8x600xf32, #tpu.memory_space<vmem>>, %arg2: memref<600x512xbf16, #tpu.memory_space<vmem>>, %arg3: memref<1x512xf32, #tpu.memory_space<vmem>>, %arg4: memref<512x256xbf16, #tpu.memory_space<vmem>>, %arg5: memref<1x256xf32, #tpu.memory_space<vmem>>, %arg6: memref<256x128xbf16, #tpu.memory_space<vmem>>, %arg7: memref<1x128xf32, #tpu.memory_space<vmem>>, %arg8: memref<1x128xf32, #tpu.memory_space<vmem>>, %arg9: memref<1x1xf32, #tpu.memory_space<vmem>>, %arg10: memref<8x1xf32, #tpu.memory_space<vmem>>) attributes {dimension_semantics = [#tpu.dimension_semantics<parallel>], iteration_bounds = array<i64: 1>, scalar_prefetch = 0 : i64, scratch_operands = 0 : i64, tpu.core_type = #tpu.core_type<tc>, window_params = [{transform_indices = @transform_0, window_bounds = array<i64: 8, 600>}, {pipeline_mode = #tpu.pipeline_mode<synchronous>, transform_indices = @transform_1, window_bounds = array<i64: 600, 512>}, {pipeline_mode = #tpu.pipeline_mode<synchronous>, transform_indices = @transform_2, window_bounds = array<i64: 1, 512>}, {pipeline_mode = #tpu.pipeline_mode<synchronous>, transform_indices = @transform_3, window_bounds = array<i64: 512, 256>}, {pipeline_mode = #tpu.pipeline_mode<synchronous>, transform_indices = @transform_4, window_bounds = array<i64: 1, 256>}, {pipeline_mode = #tpu.pipeline_mode<synchronous>, transform_indices = @transform_5, window_bounds = array<i64: 256, 128>}, {pipeline_mode = #tpu.pipeline_mode<synchronous>, transform_indices = @transform_6, window_bounds = array<i64: 1, 128>}, {pipeline_mode = #tpu.pipeline_mode<synchronous>, transform_indices = @transform_7, window_bounds = array<i64: 1, 128>}, {pipeline_mode = #tpu.pipeline_mode<synchronous>, transform_indices = @transform_8, window_bounds = array<i64: 1, 1>}, {transform_indices = @transform_9, window_bounds = array<i64: 8, 1>}]} {
    %c0 = arith.constant 0 : index
    %c0_0 = arith.constant 0 : index
    %0 = vector.load %arg1[%c0, %c0_0] : memref<8x600xf32, #tpu.memory_space<vmem>>, vector<8x600xf32>
    %1 = arith.truncf %0 : vector<8x600xf32> to vector<8x600xbf16>
    %c0_1 = arith.constant 0 : index
    %c0_2 = arith.constant 0 : index
    %2 = vector.load %arg2[%c0_1, %c0_2] : memref<600x512xbf16, #tpu.memory_space<vmem>>, vector<600x512xbf16>
    %cst = arith.constant dense<0.000000e+00> : vector<8x512xf32>
    %3 = tpu.matmul %1, %2, %cst {dimension_numbers = #tpu.dot_dimension_numbers<[1], [0], [0], [1], [0, 0, 1, 1], [], []>} : vector<8x600xbf16>, vector<600x512xbf16>, vector<8x512xf32> -> vector<8x512xf32>
    %c0_3 = arith.constant 0 : index
    %c0_4 = arith.constant 0 : index
    %4 = vector.load %arg3[%c0_3, %c0_4] : memref<1x512xf32, #tpu.memory_space<vmem>>, vector<1x512xf32>
    %5 = vector.broadcast %4 : vector<1x512xf32> to vector<8x512xf32>
    %6 = arith.addf %3, %5 : vector<8x512xf32>
    %cst_5 = arith.constant 0.000000e+00 : f32
    %7 = vector.broadcast %cst_5 : f32 to vector<8x512xf32>
    %8 = arith.maximumf %6, %7 : vector<8x512xf32>
    %9 = arith.truncf %8 : vector<8x512xf32> to vector<8x512xbf16>
    %c0_6 = arith.constant 0 : index
    %c0_7 = arith.constant 0 : index
    %10 = vector.load %arg4[%c0_6, %c0_7] : memref<512x256xbf16, #tpu.memory_space<vmem>>, vector<512x256xbf16>
    %cst_8 = arith.constant dense<0.000000e+00> : vector<8x256xf32>
    %11 = tpu.matmul %9, %10, %cst_8 {dimension_numbers = #tpu.dot_dimension_numbers<[1], [0], [0], [1], [0, 0, 1, 1], [], []>} : vector<8x512xbf16>, vector<512x256xbf16>, vector<8x256xf32> -> vector<8x256xf32>
    %c0_9 = arith.constant 0 : index
    %c0_10 = arith.constant 0 : index
    %12 = vector.load %arg5[%c0_9, %c0_10] : memref<1x256xf32, #tpu.memory_space<vmem>>, vector<1x256xf32>
    %13 = vector.broadcast %12 : vector<1x256xf32> to vector<8x256xf32>
    %14 = arith.addf %11, %13 : vector<8x256xf32>
    %cst_11 = arith.constant 0.000000e+00 : f32
    %15 = vector.broadcast %cst_11 : f32 to vector<8x256xf32>
    %16 = arith.maximumf %14, %15 : vector<8x256xf32>
    %17 = arith.truncf %16 : vector<8x256xf32> to vector<8x256xbf16>
    %c0_12 = arith.constant 0 : index
    %c0_13 = arith.constant 0 : index
    %18 = vector.load %arg6[%c0_12, %c0_13] : memref<256x128xbf16, #tpu.memory_space<vmem>>, vector<256x128xbf16>
    %cst_14 = arith.constant dense<0.000000e+00> : vector<8x128xf32>
    %19 = tpu.matmul %17, %18, %cst_14 {dimension_numbers = #tpu.dot_dimension_numbers<[1], [0], [0], [1], [0, 0, 1, 1], [], []>} : vector<8x256xbf16>, vector<256x128xbf16>, vector<8x128xf32> -> vector<8x128xf32>
    %c0_15 = arith.constant 0 : index
    %c0_16 = arith.constant 0 : index
    %20 = vector.load %arg7[%c0_15, %c0_16] : memref<1x128xf32, #tpu.memory_space<vmem>>, vector<1x128xf32>
    %21 = vector.broadcast %20 : vector<1x128xf32> to vector<8x128xf32>
    %22 = arith.addf %19, %21 : vector<8x128xf32>
    %cst_17 = arith.constant 0.000000e+00 : f32
    %23 = vector.broadcast %cst_17 : f32 to vector<8x128xf32>
    %24 = arith.maximumf %22, %23 : vector<8x128xf32>
    %c0_18 = arith.constant 0 : index
    %c0_19 = arith.constant 0 : index
    %25 = vector.load %arg8[%c0_18, %c0_19] : memref<1x128xf32, #tpu.memory_space<vmem>>, vector<1x128xf32>
    %26 = vector.broadcast %25 : vector<1x128xf32> to vector<8x128xf32>
    %27 = arith.mulf %24, %26 : vector<8x128xf32>
    %cst_20 = arith.constant dense<0.000000e+00> : vector<8xf32>
    %28 = vector.multi_reduction <add>, %27, %cst_20 [1] : vector<8x128xf32> to vector<8xf32>
    %29 = vector.shape_cast %28 : vector<8xf32> to vector<8x1xf32>
    %c0_21 = arith.constant 0 : index
    %c0_22 = arith.constant 0 : index
    %30 = vector.load %arg9[%c0_21, %c0_22] : memref<1x1xf32, #tpu.memory_space<vmem>>, vector<1x1xf32>
    %31 = vector.broadcast %30 : vector<1x1xf32> to vector<8x1xf32>
    %32 = arith.addf %29, %31 : vector<8x1xf32>
    %c0_23 = arith.constant 0 : index
    %c0_24 = arith.constant 0 : index
    %33 = vector.load %arg10[%c0_23, %c0_24] : memref<8x1xf32, #tpu.memory_space<vmem>>, vector<8x1xf32>
    tpu.vector_store %arg10[%c0_23, %c0_24], %32 {strides = array<i32>} : memref<8x1xf32, #tpu.memory_space<vmem>>, vector<8x1xf32>,
    return
  }
  func.func @transform_0(%arg0: i32) -> (i32, i32) {
    %c0_i32 = arith.constant 0 : i32
    %c0_i32_0 = arith.constant 0 : i32
    return %arg0, %c0_i32 : i32, i32
  }
  func.func @transform_1(%arg0: i32) -> (i32, i32) {
    %c0_i32 = arith.constant 0 : i32
    %c0_i32_0 = arith.constant 0 : i32
    %c0_i32_1 = arith.constant 0 : i32
    return %c0_i32, %c0_i32_0 : i32, i32
  }
  func.func @transform_2(%arg0: i32) -> (i32, i32) {
    %c0_i32 = arith.constant 0 : i32
    %c0_i32_0 = arith.constant 0 : i32
    %c0_i32_1 = arith.constant 0 : i32
    return %c0_i32, %c0_i32_0 : i32, i32
  }
  func.func @transform_3(%arg0: i32) -> (i32, i32) {
    %c0_i32 = arith.constant 0 : i32
    %c0_i32_0 = arith.constant 0 : i32
    %c0_i32_1 = arith.constant 0 : i32
    return %c0_i32, %c0_i32_0 : i32, i32
  }
  func.func @transform_4(%arg0: i32) -> (i32, i32) {
    %c0_i32 = arith.constant 0 : i32
    %c0_i32_0 = arith.constant 0 : i32
    %c0_i32_1 = arith.constant 0 : i32
    return %c0_i32, %c0_i32_0 : i32, i32
  }
  func.func @transform_5(%arg0: i32) -> (i32, i32) {
    %c0_i32 = arith.constant 0 : i32
    %c0_i32_0 = arith.constant 0 : i32
    %c0_i32_1 = arith.constant 0 : i32
    return %c0_i32, %c0_i32_0 : i32, i32
  }
  func.func @transform_6(%arg0: i32) -> (i32, i32) {
    %c0_i32 = arith.constant 0 : i32
    %c0_i32_0 = arith.constant 0 : i32
    %c0_i32_1 = arith.constant 0 : i32
    return %c0_i32, %c0_i32_0 : i32, i32
  }
  func.func @transform_7(%arg0: i32) -> (i32, i32) {
    %c0_i32 = arith.constant 0 : i32
    %c0_i32_0 = arith.constant 0 : i32
    %c0_i32_1 = arith.constant 0 : i32
    return %c0_i32, %c0_i32_0 : i32, i32
  }
  func.func @transform_8(%arg0: i32) -> (i32, i32) {
    %c0_i32 = arith.constant 0 : i32
    %c0_i32_0 = arith.constant 0 : i32
    %c0_i32_1 = arith.constant 0 : i32
    return %c0_i32, %c0_i32_0 : i32, i32
  }
  func.func @transform_9(%arg0: i32) -> (i32, i32) {
    %c0_i32 = arith.constant 0 : i32
    %c0_i32_0 = arith.constant 0 : i32
    return %arg0, %c0_i32 : i32, i32
  }
}

</mosaic_0001>

<bundles_post_ra>
// kernel: tpu_custom_call.1
= control target key start
LH: loop header
LB: loop body
LE: loop exit
PB: predicated region body
PF: predicated region fallthrough
CT: control target
= control target key end

     0   :  { %s2805_s0 = inlined_call_operand.hbm [shape: f32[8,600], index: 0, kind: input, shape index: {}]   ;;  %s2806_s1 = inlined_call_operand.hbm [shape: bf16[600,512], index: 1, kind: input, shape index: {}]   ;;  %s2807_s2 = inlined_call_operand.vmem [shape: f32[1,512], index: 2, kind: input, shape index: {}]   ;;  %s2808_s3 = inlined_call_operand.hbm [shape: bf16[512,256], index: 3, kind: input, shape index: {}]   ;;  %s2809_s4 = inlined_call_operand.vmem [shape: f32[1,256], index: 4, kind: input, shape index: {}]   ;;  %s2810_s5 = inlined_call_operand.hbm [shape: bf16[256,128], index: 5, kind: input, shape index: {}]   ;;  %s2811_s6 = inlined_call_operand.vmem [shape: f32[1,128], index: 6, kind: input, shape index: {}]   ;;  %s2812_s7 = inlined_call_operand.vmem [shape: f32[1,128], index: 7, kind: input, shape index: {}]   ;;  %s2813_s8 = inlined_call_operand.<no memory space> [shape: f32[1,1], index: 8, kind: input, shape index: {}]   ;;  %s2814_s9 = inlined_call_operand.vmem [shape: f32[8,1], index: 9, kind: output, shape index: {}]  }
   0x1   :  { %v14_v0 = vstv %s2813_s8 }
   0x2   :  { %15 = vst [vmem:[#allocation2] sm:$0x1] %v14_v0 }
   0x3   :  { %16 = vsyncpa [#allocation4], 0 }
   0x4   :  { %17 = vsyncpa [#allocation6], 0 }
   0x5   :  { %18 = vsyncpa [#allocation9], 0  ;;  %s2672_s11 = smov [#allocation5]  }
   0x6   :  { %s34_s12 = sshll.u32 %s2672_s11, 4  ;;  %s35_s12 = int_to_ptr.vmem [resolvable:$true] %s34_s12 }
   0x7   :  { %s2594_s13 = scalar_lea.vmem %s35_s12, 19200  ;;  %p2599_p1 = scmp.lt.s32.totalorder %s35_s12, %s35_s12 }
   0x8   :  { %p2595_p0 = scmp.ne.s32.totalorder %s35_s12, %s2594_s13  ;;  %p2600_p2 = scmp.lt.s32.totalorder %s2594_s13, %s2594_s13 }
   0xa   :  { %p2601_p3 = por %p2600_p2, %p2599_p1 }
   0xc   :  { %p2602_p4 = pnand %p2601_p3, %p2595_p0 }
   0xe   :  { %2605 = shalt.err (!%p2602_p4)
}
   0xf   :  { %s2673_s14 = smov 256   ;;  %s2674_s15 = smov 16  }
  0x10   :  { %40 = dma.hbm_to_vmem [thread:$0]  %s2806_s1, 19200, %s35_s12, [#allocation6], %s2673_s14, %s2673_s14, %s2674_s15  }
  0x11   :  { %s2675_s8 = smov [#allocation3]   ;;  %s2676_s19 = smov [#allocation7]  }
  0x12   :  { %s25_s18 = sshll.u32 %s2675_s8, 4  ;;  %s48_s20 = sshll.u32 %s2676_s19, 4  ;;  %s26_s18 = int_to_ptr.vmem [resolvable:$true] %s25_s18  ;;  %s49_s20 = int_to_ptr.vmem [resolvable:$true] %s48_s20 }
  0x13   :  { %s2614_s21 = scalar_lea.vmem %s26_s18, 640  ;;  %p2619_p6 = scmp.lt.s32.totalorder %s26_s18, %s26_s18 }
  0x14   :  { %p2615_p5 = scmp.ne.s32.totalorder %s26_s18, %s2614_s21  ;;  %p2620_p7 = scmp.lt.s32.totalorder %s2614_s21, %s2614_s21 }
  0x16   :  { %p2621_p8 = por %p2620_p7, %p2619_p6 }
  0x18   :  { %p2622_p9 = pnand %p2621_p8, %p2615_p5 }
  0x1a   :  { %2625 = shalt.err (!%p2622_p9)
}
  0x1b   :  { %28 = dma.hbm_to_vmem [thread:$0]  %s2805_s0, 640, %s26_s18, [#allocation4]  }
  0x1c   :  { %s2634_s24 = scalar_lea.vmem %s49_s20, 8192  ;;  %p2639_p11 = scmp.lt.s32.totalorder %s49_s20, %s49_s20 }
  0x1d   :  { %p2635_p10 = scmp.ne.s32.totalorder %s49_s20, %s2634_s24  ;;  %p2640_p12 = scmp.lt.s32.totalorder %s2634_s24, %s2634_s24 }
  0x1f   :  { %p2641_p13 = por %p2640_p12, %p2639_p11 }
  0x21   :  { %p2642_p0 = pnand %p2641_p13, %p2635_p10 }
  0x23   :  { %2645 = shalt.err (!%p2642_p0)
}
  0x24   :  { %s2677_s1 = smov 128   ;;  %s2678_s25 = smov 8  }
  0x25   :  { %54 = dma.hbm_to_vmem [thread:$0]  %s2808_s3, 8192, %s49_s20, [#allocation6], %s2677_s1, %s2677_s1, %s2678_s25  }
  0x26   :  { %s2679_s28 = smov [#allocation8]  }
  0x27   :  { %s62_s29 = sshll.u32 %s2679_s28, 4  ;;  %s63_s29 = int_to_ptr.vmem [resolvable:$true] %s62_s29 }
  0x28   :  { %s2654_s30 = scalar_lea.vmem %s63_s29, 2048  ;;  %p2659_p2 = scmp.lt.s32.totalorder %s63_s29, %s63_s29 }
  0x29   :  { %p2655_p1 = scmp.ne.s32.totalorder %s63_s29, %s2654_s30  ;;  %p2660_p3 = scmp.lt.s32.totalorder %s2654_s30, %s2654_s30 }
  0x2b   :  { %p2661_p4 = por %p2660_p3, %p2659_p2 }
  0x2d   :  { %p2662_p5 = pnand %p2661_p4, %p2655_p1 }
  0x2f   :  { %2665 = shalt.err (!%p2662_p5)
}
  0x30   :  { %s2680_s0 = smov 64   ;;  %s2681_s10 = smov 4  }
  0x31   :  { %68 = dma.hbm_to_vmem [thread:$0]  %s2810_s5, 2048, %s63_s29, [#allocation9], %s2680_s0, %s2680_s0, %s2681_s10  }
  0x32   :  { %2666 = dma.done.wait [#allocation4], 640  }
  0x33   :  { %2667 = vsyncadd [#allocation4], 4294966656 }
  0x34   :  { %2668 = dma.done.wait [#allocation6], 27392  }
  0x35   :  { %2669 = vsyncadd [#allocation6], 4294939904 }
  0x36   :  { %2670 = dma.done.wait [#allocation9], 2048  }
  0x37   :  { %2671 = vsyncadd [#allocation9], 4294965248  ;;  %v2248_v1 = vld [vmem:[#allocation5 + $0xe4] ss:$16 sps:$4 sm:$0xff]   ;;  %v2252_v3 = vld [vmem:[#allocation5 + $0xe0] ss:$16 sps:$4 sm:$0xff]  }
  0x38   :  { %v2250_v2 = vld [vmem:[#allocation5 + $0x2e4] ss:$16 sps:$4 sm:$0xff]   ;;  %1037 = vmatprep.subr.bf16.mxu0 %v2248_v1  ;;  %v2253_v4 = vld [vmem:[#allocation5 + $0x2e0] ss:$16 sps:$4 sm:$0xff]   ;;  %vm1024_vm0 = vcmask 1043456   ;;  %vm1020_vm1 = vcmask 719872  }
  0x39   :  { %1078 = vmatprep.subr.bf16.mxu1 %v2250_v2  ;;  %v2254_v5 = vld [vmem:[#allocation5 + $0xc4] ss:$16 sps:$4 sm:$0xff]   ;;  %1038 = vmatpush1.bf16.msra.mxu0 %v2252_v3  ;;  %v2258_v7 = vld [vmem:[#allocation5 + $0xc0] ss:$16 sps:$4 sm:$0xff]   ;;  %vm1967_vm2 = vcmask 7168  }
  0x3a   :  { %1079 = vmatpush1.bf16.msra.mxu1 %v2253_v4  ;;  %v2256_v6 = vld [vmem:[#allocation5 + $0x2c4] ss:$16 sps:$4 sm:$0xff]   ;;  %1039 = vmatprep.subr.bf16.mxu0 %v2254_v5  ;;  %v2259_v8 = vld [vmem:[#allocation5 + $0x2c0] ss:$16 sps:$4 sm:$0xff]  }
  0x3b   :  { %1080 = vmatprep.subr.bf16.mxu1 %v2256_v6  ;;  %v2260_v9 = vld [vmem:[#allocation5 + $0xa4] ss:$16 sps:$4 sm:$0xff]   ;;  %v2264_v11 = vld [vmem:[#allocation5 + $0xa0] ss:$16 sps:$4 sm:$0xff]   ;;  %v88_v6 = vld [vmem:[#allocation3] sm:$0xff] }
  0x3c   :  { %v2262_v10 = vld [vmem:[#allocation5 + $0x2a4] ss:$16 sps:$4 sm:$0xff]   ;;  %v2265_v12 = vld [vmem:[#allocation5 + $0x2a0] ss:$16 sps:$4 sm:$0xff]  }
  0x3d   :  { %1040 = vmatpush1.bf16.msra.mxu0 %v2258_v7  ;;  %v2266_v13 = vld [vmem:[#allocation5 + $0x84] ss:$16 sps:$4 sm:$0xff]   ;;  %v2270_v15 = vld [vmem:[#allocation5 + $0x80] ss:$16 sps:$4 sm:$0xff]   ;;  %v90_v7 = vld [vmem:[#allocation3 + $0x10] sm:$0xff] }
  0x3e   :  { %1081 = vmatpush1.bf16.msra.mxu1 %v2259_v8  ;;  %1041 = vmatprep.subr.bf16.mxu0 %v2260_v9  ;;  %v2268_v14 = vld [vmem:[#allocation5 + $0x284] ss:$16 sps:$4 sm:$0xff]   ;;  %v2271_v16 = vld [vmem:[#allocation5 + $0x280] ss:$16 sps:$4 sm:$0xff]  }
  0x3f   :  { %1082 = vmatprep.subr.bf16.mxu1 %v2262_v10  ;;  %v2272_v17 = vld [vmem:[#allocation5 + $0x64] ss:$16 sps:$4 sm:$0xff]   ;;  %v2276_v19 = vld [vmem:[#allocation5 + $0x60] ss:$16 sps:$4 sm:$0xff]   ;;  %v2366_v10 = vld [vmem:[#allocation5 + $0x2ec] ss:$16 sps:$4 sm:$0xff]  }
  0x40   :  { %v2274_v18 = vld [vmem:[#allocation5 + $0x264] ss:$16 sps:$4 sm:$0xff]   ;;  %v2277_v20 = vld [vmem:[#allocation5 + $0x260] ss:$16 sps:$4 sm:$0xff]  }
  0x41   :  { %1042 = vmatpush1.bf16.msra.mxu0 %v2264_v11  ;;  %v2278_v21 = vld [vmem:[#allocation5 + $0x44] ss:$16 sps:$4 sm:$0xff]   ;;  %v2282_v23 = vld [vmem:[#allocation5 + $0x40] ss:$16 sps:$4 sm:$0xff]   ;;  %v2754_v11 = vpack.c.bf16 %v88_v6, %v88_v6  ;;  %v2442_v6 = vld [vmem:[#allocation5 + $0x348] ss:$16 sps:$4 sm:$0xff]  }
  0x42   :  { %1083 = vmatpush1.bf16.msra.mxu1 %v2265_v12  ;;  %1043 = vmatprep.subr.bf16.mxu0 %v2266_v13  ;;  %v2280_v22 = vld [vmem:[#allocation5 + $0x244] ss:$16 sps:$4 sm:$0xff]   ;;  %v2283_v24 = vld [vmem:[#allocation5 + $0x240] ss:$16 sps:$4 sm:$0xff]   ;;  %v2756_v12 = vpack.c.bf16 %v90_v7, %v90_v7  ;;  %v2450_v7 = vld [vmem:[#allocation5 + $0x32c] ss:$16 sps:$4 sm:$0xff]  }
  0x43   :  { %1084 = vmatprep.subr.bf16.mxu1 %v2268_v14  ;;  %v2284_v25 = vld [vmem:[#allocation5 + $0x24] ss:$16 sps:$4 sm:$0xff]   ;;  %v2288_v27 = vld [vmem:[#allocation5 + $0x20] ss:$16 sps:$4 sm:$0xff]  }
  0x44   :  { %v2286_v26 = vld [vmem:[#allocation5 + $0x224] ss:$16 sps:$4 sm:$0xff]   ;;  %v2289_v28 = vld [vmem:[#allocation5 + $0x220] ss:$16 sps:$4 sm:$0xff]  }
  0x45   :  { %1044 = vmatpush1.bf16.msra.mxu0 %v2270_v15  ;;  %v2290_v29 = vld [vmem:[#allocation5 + $0x4] ss:$16 sps:$4 sm:$0xff]   ;;  %v2294_v31 = vld [vmem:[#allocation5] ss:$16 sps:$4 sm:$0xff]   ;;  %v2364_v15 = vld [vmem:[#allocation5 + $0x2e8] ss:$16 sps:$4 sm:$0xff]  }
  0x46   :  { %1085 = vmatpush1.bf16.msra.mxu1 %v2271_v16  ;;  %1045 = vmatprep.subr.bf16.mxu0 %v2272_v17  ;;  %v2292_v30 = vld [vmem:[#allocation5 + $0x204] ss:$16 sps:$4 sm:$0xff]   ;;  %v2295_v32 = vld [vmem:[#allocation5 + $0x200] ss:$16 sps:$4 sm:$0xff]   ;;  %v2372_v16 = vld [vmem:[#allocation5 + $0x2cc] ss:$16 sps:$4 sm:$0xff]  }
  0x47   :  { %1086 = vmatprep.subr.bf16.mxu1 %v2274_v18  ;;  %v2296_v33 = vld [vmem:[#allocation5 + $0x1e4] ss:$16 sps:$4 sm:$0xff]   ;;  %v2300_v35 = vld [vmem:[#allocation5 + $0x1e0] ss:$16 sps:$4 sm:$0xff]   ;;  %v2682_v18 = vmov 0  }
  0x48   :  { %v2298_v34 = vld [vmem:[#allocation5 + $0x3e4] ss:$16 sps:$4 sm:$0xff]   ;;  %v2301_v36 = vld [vmem:[#allocation5 + $0x3e0] ss:$16 sps:$4 sm:$0xff]  }
  0x49   :  { %1046 = vmatpush1.bf16.msra.mxu0 %v2276_v19  ;;  %v2302_v37 = vld [vmem:[#allocation5 + $0x1c4] ss:$16 sps:$4 sm:$0xff]   ;;  %v2306_v39 = vld [vmem:[#allocation5 + $0x1c0] ss:$16 sps:$4 sm:$0xff]  }
  0x4a   :  { %1087 = vmatpush1.bf16.msra.mxu1 %v2277_v20  ;;  %1047 = vmatprep.subr.bf16.mxu0 %v2278_v21  ;;  %v2304_v38 = vld [vmem:[#allocation5 + $0x3c4] ss:$16 sps:$4 sm:$0xff]   ;;  %v2307_v40 = vld [vmem:[#allocation5 + $0x3c0] ss:$16 sps:$4 sm:$0xff]   ;;  %v2370_v20 = vld [vmem:[#allocation5 + $0x2c8] ss:$16 sps:$4 sm:$0xff]  }
  0x4b   :  { %1088 = vmatprep.subr.bf16.mxu1 %v2280_v22  ;;  %v2308_v41 = vld [vmem:[#allocation5 + $0x1a4] ss:$16 sps:$4 sm:$0xff]   ;;  %v2312_v43 = vld [vmem:[#allocation5 + $0x1a0] ss:$16 sps:$4 sm:$0xff]   ;;  %v2378_v21 = vld [vmem:[#allocation5 + $0x2ac] ss:$16 sps:$4 sm:$0xff]  }
  0x4c   :  { %v2310_v42 = vld [vmem:[#allocation5 + $0x3a4] ss:$16 sps:$4 sm:$0xff]   ;;  %v2313_v44 = vld [vmem:[#allocation5 + $0x3a0] ss:$16 sps:$4 sm:$0xff]  }
  0x4d   :  { %1048 = vmatpush1.bf16.msra.mxu0 %v2282_v23  ;;  %v2314_v45 = vld [vmem:[#allocation5 + $0x184] ss:$16 sps:$4 sm:$0xff]   ;;  %v2318_v48 = vld [vmem:[#allocation5 + $0x180] ss:$16 sps:$4 sm:$0xff]  }
  0x4e   :  { %1089 = vmatpush1.bf16.msra.mxu1 %v2283_v24  ;;  %1049 = vmatprep.subr.bf16.mxu0 %v2284_v25  ;;  %v2316_v46 = vld [vmem:[#allocation5 + $0x384] ss:$16 sps:$4 sm:$0xff]   ;;  %v2319_v51 = vld [vmem:[#allocation5 + $0x380] ss:$16 sps:$4 sm:$0xff]   ;;  %v2376_v24 = vld [vmem:[#allocation5 + $0x2a8] ss:$16 sps:$4 sm:$0xff]  }
  0x4f   :  { %1090 = vmatprep.subr.bf16.mxu1 %v2286_v26  ;;  %v89_v47 = vld [vmem:[#allocation3 + $0x8] sm:$0xff]  ;;  %v91_v50 = vld [vmem:[#allocation3 + $0x18] sm:$0xff]  ;;  %v2384_v25 = vld [vmem:[#allocation5 + $0x28c] ss:$16 sps:$4 sm:$0xff]  }
  0x50   :  { %v2748_v49 = vpack.c.bf16 %v89_v47, %v89_v47  ;;  %v2750_v52 = vpack.c.bf16 %v91_v50, %v91_v50  ;;  %v2320_v53 = vld [vmem:[#allocation5 + $0x164] ss:$16 sps:$4 sm:$0xff]   ;;  %v2324_v55 = vld [vmem:[#allocation5 + $0x160] ss:$16 sps:$4 sm:$0xff]   ;;  %v2414_v47 = vld [vmem:[#allocation5 + $0x3ec] ss:$16 sps:$4 sm:$0xff]  }
  0x51   :  { %1050 = vmatpush1.bf16.msra.mxu0 %v2288_v27  ;;  %v2322_v54 = vld [vmem:[#allocation5 + $0x364] ss:$16 sps:$4 sm:$0xff]   ;;  %v2325_v56 = vld [vmem:[#allocation5 + $0x360] ss:$16 sps:$4 sm:$0xff]   ;;  %v2381_v50 = vld [vmem:[#allocation5 + $0x8c] ss:$16 sps:$4 sm:$0xff]  }
  0x52   :  { %1091 = vmatpush1.bf16.msra.mxu1 %v2289_v28  ;;  %1051 = vmatprep.subr.bf16.mxu0 %v2290_v29  ;;  %v2326_v57 = vld [vmem:[#allocation5 + $0x144] ss:$16 sps:$4 sm:$0xff]   ;;  %v2330_v59 = vld [vmem:[#allocation5 + $0x140] ss:$16 sps:$4 sm:$0xff]   ;;  %v2382_v28 = vld [vmem:[#allocation5 + $0x288] ss:$16 sps:$4 sm:$0xff]  }
  0x53   :  { %1092 = vmatprep.subr.bf16.mxu1 %v2292_v30  ;;  %1069 = vmatprep.mubr.bf16.mxu0 %v2748_v49  ;;  %v2328_v58 = vld [vmem:[#allocation5 + $0x344] ss:$16 sps:$4 sm:$0xff]   ;;  %v2331_v60 = vld [vmem:[#allocation5 + $0x340] ss:$16 sps:$4 sm:$0xff]   ;;  %v2390_v29 = vld [vmem:[#allocation5 + $0x26c] ss:$16 sps:$4 sm:$0xff]  }
  0x54   :  { %1110 = vmatprep.mubr.bf16.mxu1 %v2750_v52  ;;  %v2332_v61 = vld [vmem:[#allocation5 + $0x124] ss:$16 sps:$4 sm:$0xff]   ;;  %v2336_v63 = vld [vmem:[#allocation5 + $0x120] ss:$16 sps:$4 sm:$0xff]  }
  0x55   :  { %1052 = vmatpush1.bf16.msra.mxu0 %v2294_v31  ;;  %v2334_v62 = vld [vmem:[#allocation5 + $0x324] ss:$16 sps:$4 sm:$0xff]   ;;  %v2337_v0 = vld [vmem:[#allocation5 + $0x320] ss:$16 sps:$4 sm:$0xff]  }
  0x56   :  { %1093 = vmatpush1.bf16.msra.mxu1 %v2295_v32  ;;  %1053 = vmatprep.subr.bf16.mxu0 %v2296_v33  ;;  %v2338_v1 = vld [vmem:[#allocation5 + $0x104] ss:$16 sps:$4 sm:$0xff]   ;;  %v2342_v3 = vld [vmem:[#allocation5 + $0x100] ss:$16 sps:$4 sm:$0xff]   ;;  %v2388_v32 = vld [vmem:[#allocation5 + $0x268] ss:$16 sps:$4 sm:$0xff]  }
  0x57   :  { %1094 = vmatprep.subr.bf16.mxu1 %v2298_v34  ;;  %v2340_v2 = vld [vmem:[#allocation5 + $0x304] ss:$16 sps:$4 sm:$0xff]   ;;  %v2343_v5 = vld [vmem:[#allocation5 + $0x300] ss:$16 sps:$4 sm:$0xff]   ;;  %v2396_v33 = vld [vmem:[#allocation5 + $0x24c] ss:$16 sps:$4 sm:$0xff]  }
  0x58   :  { %v246_v4 = vld [vmem:[#allocation5 + $0x4a0] sm:$0xff] }
  0x59   :  { %1054 = vmatpush2.bf16.msra.mxu0 %v2300_v35  ;;  %v2125_v8 = vcombine.high %v246_v4, %v246_v4  ;;  %v2124_v9 = vcombine.low %v246_v4, %v246_v4  ;;  %v2348_v14 = vld [vmem:[#allocation5 + $0x484] ss:$16 sps:$4 sm:$0xff]   ;;  %v2346_v17 = vld [vmem:[#allocation5 + $0x480] ss:$16 sps:$4 sm:$0xff]   ;;  %v92_v35 = vld [vmem:[#allocation3 + $0x20] sm:$0xff] }
  0x5a   :  { %1095 = vmatpush2.bf16.msra.mxu1 %v2301_v36  ;;  %1055 = vmatprep.subr.bf16.mxu0 %v2302_v37  ;;  %v2351_v19 = vld [vmem:[#allocation5 + $0x464] ss:$16 sps:$4 sm:$0xff]   ;;  %v2349_v22 = vld [vmem:[#allocation5 + $0x460] ss:$16 sps:$4 sm:$0xff]   ;;  %v2363_v36 = vld [vmem:[#allocation5 + $0xec] ss:$16 sps:$4 sm:$0xff]  }
  0x5b   :  { %1096 = vmatprep.subr.bf16.mxu1 %v2304_v38  ;;  %v1026_v13 = vsel %vm1024_vm0, %v2124_v9, 0  ;;  %v2354_v23 = vld [vmem:[#allocation5 + $0x444] ss:$16 sps:$4 sm:$0xff]   ;;  %v2352_v26 = vld [vmem:[#allocation5 + $0x440] ss:$16 sps:$4 sm:$0xff]  }
  0x5c   :  { %v2357_v27 = vld [vmem:[#allocation5 + $0x424] ss:$16 sps:$4 sm:$0xff]   ;;  %v2355_v30 = vld [vmem:[#allocation5 + $0x420] ss:$16 sps:$4 sm:$0xff]   ;;  %v2394_v37 = vld [vmem:[#allocation5 + $0x248] ss:$16 sps:$4 sm:$0xff]  }
  0x5d   :  { %1056 = vmatpush2.bf16.msra.mxu0 %v2306_v39  ;;  %v2360_v31 = vld [vmem:[#allocation5 + $0x404] ss:$16 sps:$4 sm:$0xff]   ;;  %v2358_v34 = vld [vmem:[#allocation5 + $0x400] ss:$16 sps:$4 sm:$0xff]   ;;  %v2402_v38 = vld [vmem:[#allocation5 + $0x22c] ss:$16 sps:$4 sm:$0xff]   ;;  %v2764_v39 = vpack.c.bf16 %v92_v35, %v92_v35 }
  0x5e   :  { %1097 = vmatpush2.bf16.msra.mxu1 %v2307_v40  ;;  %1057 = vmatprep.subr.bf16.mxu0 %v2308_v41  ;;  %v2361_v40 = vld [vmem:[#allocation5 + $0xe8] ss:$16 sps:$4 sm:$0xff]   ;;  %v2369_v41 = vld [vmem:[#allocation5 + $0xcc] ss:$16 sps:$4 sm:$0xff]  }
  0x5f   :  { %1098 = vmatprep.subr.bf16.mxu1 %v2310_v42  ;;  %v2400_v42 = vld [vmem:[#allocation5 + $0x228] ss:$16 sps:$4 sm:$0xff]   ;;  %v2417_v9 = vld [vmem:[#allocation5 + $0x1cc] ss:$16 sps:$4 sm:$0xff]  }
  0x60   :  { %v2403_v4 = vld [vmem:[#allocation5 + $0x8] ss:$16 sps:$4 sm:$0xff]   ;;  %v2453_v35 = vld [vmem:[#allocation5 + $0x10c] ss:$16 sps:$4 sm:$0xff]  }
  0x61   :  { %1058 = vmatpush2.bf16.msra.mxu0 %v2312_v43  ;;  %v2408_v43 = vld [vmem:[#allocation5 + $0x20c] ss:$16 sps:$4 sm:$0xff]  }
  0x62   :  { %1099 = vmatpush2.bf16.msra.mxu1 %v2313_v44  ;;  %1059 = vmatprep.subr.bf16.mxu0 %v2314_v45  ;;  %v2367_v44 = vld [vmem:[#allocation5 + $0xc8] ss:$16 sps:$4 sm:$0xff]   ;;  %v2375_v45 = vld [vmem:[#allocation5 + $0xac] ss:$16 sps:$4 sm:$0xff]  }
  0x63   :  { %1100 = vmatprep.subr.bf16.mxu1 %v2316_v46  ;;  %v2406_v46 = vld [vmem:[#allocation5 + $0x208] ss:$16 sps:$4 sm:$0xff]  }
  0x65   :  { %1060 = vmatpush2.bf16.msra.mxu0 %v2318_v48  ;;  %v2373_v48 = vld [vmem:[#allocation5 + $0xa8] ss:$16 sps:$4 sm:$0xff]  }
  0x66   :  { %1101 = vmatpush2.bf16.msra.mxu1 %v2319_v51  ;;  %1061 = vmatprep.subr.bf16.mxu0 %v2320_v53  ;;  %v2412_v51 = vld [vmem:[#allocation5 + $0x3e8] ss:$16 sps:$4 sm:$0xff]  }
  0x67   :  { %1102 = vmatprep.subr.bf16.mxu1 %v2322_v54  ;;  %v2379_v53 = vld [vmem:[#allocation5 + $0x88] ss:$16 sps:$4 sm:$0xff]   ;;  %v2387_v54 = vld [vmem:[#allocation5 + $0x6c] ss:$16 sps:$4 sm:$0xff]  }
  0x69   :  { %1062 = vmatpush2.bf16.msra.mxu0 %v2324_v55  ;;  %v2426_v55 = vld [vmem:[#allocation5 + $0x3ac] ss:$16 sps:$4 sm:$0xff]  }
  0x6a   :  { %1103 = vmatpush2.bf16.msra.mxu1 %v2325_v56  ;;  %1063 = vmatprep.subr.bf16.mxu0 %v2326_v57  ;;  %v2385_v56 = vld [vmem:[#allocation5 + $0x68] ss:$16 sps:$4 sm:$0xff]   ;;  %v2393_v57 = vld [vmem:[#allocation5 + $0x4c] ss:$16 sps:$4 sm:$0xff]  }
  0x6b   :  { %1104 = vmatprep.subr.bf16.mxu1 %v2328_v58  ;;  %v2424_v58 = vld [vmem:[#allocation5 + $0x3a8] ss:$16 sps:$4 sm:$0xff]  }
  0x6d   :  { %1064 = vmatpush2.bf16.msra.mxu0 %v2330_v59  ;;  %v2432_v59 = vld [vmem:[#allocation5 + $0x38c] ss:$16 sps:$4 sm:$0xff]  }
  0x6e   :  { %1105 = vmatpush2.bf16.msra.mxu1 %v2331_v60  ;;  %1065 = vmatprep.subr.bf16.mxu0 %v2332_v61  ;;  %v2391_v60 = vld [vmem:[#allocation5 + $0x48] ss:$16 sps:$4 sm:$0xff]   ;;  %v2399_v61 = vld [vmem:[#allocation5 + $0x2c] ss:$16 sps:$4 sm:$0xff]  }
  0x6f   :  { %1106 = vmatprep.subr.bf16.mxu1 %v2334_v62  ;;  %v2430_v62 = vld [vmem:[#allocation5 + $0x388] ss:$16 sps:$4 sm:$0xff]  }
  0x71   :  { %1066 = vmatpush2.bf16.msra.mxu0 %v2336_v63  ;;  %v2438_v63 = vld [vmem:[#allocation5 + $0x36c] ss:$16 sps:$4 sm:$0xff]  }
  0x72   :  { %1107 = vmatpush2.bf16.msra.mxu1 %v2337_v0  ;;  %1067 = vmatprep.subr.bf16.mxu0 %v2338_v1  ;;  %v2397_v0 = vld [vmem:[#allocation5 + $0x28] ss:$16 sps:$4 sm:$0xff]   ;;  %v2405_v1 = vld [vmem:[#allocation5 + $0xc] ss:$16 sps:$4 sm:$0xff]  }
  0x73   :  { %1108 = vmatprep.subr.bf16.mxu1 %v2340_v2  ;;  %v2436_v2 = vld [vmem:[#allocation5 + $0x368] ss:$16 sps:$4 sm:$0xff]  }
  0x75   :  { %1068 = vmatpush2.bf16.msra.mxu0 %v2342_v3  ;;  %v2444_v3 = vld [vmem:[#allocation5 + $0x34c] ss:$16 sps:$4 sm:$0xff]  }
  0x76   :  { %1109 = vmatpush2.bf16.msra.mxu1 %v2343_v5  ;;  %1201 = vmatprep.subr.bf16.mxu0 %v2366_v10  ;;  %v2411_v5 = vld [vmem:[#allocation5 + $0x1ec] ss:$16 sps:$4 sm:$0xff]   ;;  %v2448_v10 = vld [vmem:[#allocation5 + $0x328] ss:$16 sps:$4 sm:$0xff]  }
  0x77   :  { %2128 = vmatprep.subr.msk.bf16.mxu1 %vm1024_vm0, %v2125_v8  ;;  %v2409_v8 = vld [vmem:[#allocation5 + $0x1e8] ss:$16 sps:$4 sm:$0xff]  }
  0x78   :  { %1070 = vmatmul.mubr.bf16.vlgmr.msra.gmra.mxu0 %v2754_v11 }
  0x79   :  { %1111 = vmatmul.mubr.bf16.vlgmr.msra.gmra.mxu1 %v2756_v12  ;;  %1202 = vmatpush1.bf16.msra.mxu0 %v2364_v15  ;;  %v2423_v15 = vld [vmem:[#allocation5 + $0x1ac] ss:$16 sps:$4 sm:$0xff]  }
  0x7a   :  { %1124 = vmatpush1.bf16.msra.mxu1 %v1026_v13  ;;  %1151 = vmatprep.mubr.bf16.mxu1 %v2682_v18  ;;  %v2456_v13 = vld [vmem:[#allocation5 + $0x30c] ss:$16 sps:$4 sm:$0xff]  }
  0x7b   :  { %1125 = vmatprep.subr.bf16.mxu1 %v2348_v14  ;;  %1203 = vmatprep.subr.bf16.mxu0 %v2372_v16  ;;  %v2415_v14 = vld [vmem:[#allocation5 + $0x1c8] ss:$16 sps:$4 sm:$0xff]  }
  0x7c   :  { %1233 = vmatprep.mubr.bf16.mxu0 %v2750_v52  ;;  %v2420_v52 = vld [vmem:[#allocation5 + $0x3cc] ss:$16 sps:$4 sm:$0xff]   ;;  %v2454_v16 = vld [vmem:[#allocation5 + $0x308] ss:$16 sps:$4 sm:$0xff]  }
  0x7d   :  { %1204 = vmatpush1.bf16.msra.mxu0 %v2370_v20  ;;  %v2429_v20 = vld [vmem:[#allocation5 + $0x18c] ss:$16 sps:$4 sm:$0xff]  }
  0x7e   :  { %1126 = vmatpush1.bf16.msra.mxu1 %v2346_v17  ;;  %1205 = vmatprep.subr.bf16.mxu0 %v2378_v21  ;;  %v2476_v17 = vld [vmem:[#allocation7 + $0x74] ss:$8 sps:$4 sm:$0xff]   ;;  %v2474_v21 = vld [vmem:[#allocation7 + $0x70] ss:$8 sps:$4 sm:$0xff]  }
  0x7f   :  { %1127 = vmatprep.subr.bf16.mxu1 %v2351_v19  ;;  %v2421_v19 = vld [vmem:[#allocation5 + $0x1a8] ss:$16 sps:$4 sm:$0xff]  }
  0x81   :  { %1206 = vmatpush1.bf16.msra.mxu0 %v2376_v24  ;;  %v2435_v24 = vld [vmem:[#allocation5 + $0x16c] ss:$16 sps:$4 sm:$0xff]  }
  0x82   :  { %1128 = vmatpush1.bf16.msra.mxu1 %v2349_v22  ;;  %1207 = vmatprep.subr.bf16.mxu0 %v2384_v25  ;;  %v2427_v22 = vld [vmem:[#allocation5 + $0x188] ss:$16 sps:$4 sm:$0xff]  }
  0x83   :  { %1129 = vmatprep.subr.bf16.mxu1 %v2354_v23  ;;  %v2479_v23 = vld [vmem:[#allocation7 + $0x64] ss:$8 sps:$4 sm:$0xff]   ;;  %v2477_v25 = vld [vmem:[#allocation7 + $0x60] ss:$8 sps:$4 sm:$0xff]  }
  0x85   :  { %1208 = vmatpush1.bf16.msra.mxu0 %v2382_v28  ;;  %v2441_v28 = vld [vmem:[#allocation5 + $0x14c] ss:$16 sps:$4 sm:$0xff]  }
  0x86   :  { %1130 = vmatpush1.bf16.msra.mxu1 %v2352_v26  ;;  %1209 = vmatprep.subr.bf16.mxu0 %v2390_v29  ;;  %v2482_v26 = vld [vmem:[#allocation7 + $0x54] ss:$8 sps:$4 sm:$0xff]   ;;  %v2480_v29 = vld [vmem:[#allocation7 + $0x50] ss:$8 sps:$4 sm:$0xff]  }
  0x87   :  { %1131 = vmatprep.subr.bf16.mxu1 %v2357_v27  ;;  %v2433_v27 = vld [vmem:[#allocation5 + $0x168] ss:$16 sps:$4 sm:$0xff]  }
  0x89   :  { %1210 = vmatpush1.bf16.msra.mxu0 %v2388_v32  ;;  %v2447_v32 = vld [vmem:[#allocation5 + $0x12c] ss:$16 sps:$4 sm:$0xff]  }
  0x8a   :  { %1132 = vmatpush1.bf16.msra.mxu1 %v2355_v30  ;;  %1211 = vmatprep.subr.bf16.mxu0 %v2396_v33  ;;  %v2439_v30 = vld [vmem:[#allocation5 + $0x148] ss:$16 sps:$4 sm:$0xff]  }
  0x8b   :  { %1133 = vmatprep.subr.bf16.mxu1 %v2360_v31  ;;  %v2485_v31 = vld [vmem:[#allocation7 + $0x44] ss:$8 sps:$4 sm:$0xff]   ;;  %v2483_v33 = vld [vmem:[#allocation7 + $0x40] ss:$8 sps:$4 sm:$0xff]  }
  0x8d   :  { %1212 = vmatpush1.bf16.msra.mxu0 %v2394_v37  ;;  %v247_v37 = vld [vmem:[#allocation5 + $0x4a8] sm:$0xff] }
  0x8e   :  { %1134 = vmatpush1.bf16.msra.mxu1 %v2358_v34  ;;  %1213 = vmatprep.subr.bf16.mxu0 %v2402_v38  ;;  %v2488_v34 = vld [vmem:[#allocation7 + $0x34] ss:$8 sps:$4 sm:$0xff]   ;;  %v2491_v38 = vld [vmem:[#allocation7 + $0x24] ss:$8 sps:$4 sm:$0xff]  }
  0x8f   :  { %1160 = vmatprep.subr.bf16.mxu1 %v2363_v36  ;;  %v2486_v36 = vld [vmem:[#allocation7 + $0x30] ss:$8 sps:$4 sm:$0xff]  }
  0x91   :  { %2129 = vmatmul.mubr.msk.bf16.vlgmr.msra.gmra.mxu1 %vm1020_vm1, %v2764_v39  ;;  %1214 = vmatpush1.bf16.msra.mxu0 %v2400_v42  ;;  %v2126_v42 = vcombine.low %v247_v37, %v247_v37 }
  0x92   :  { %1161 = vmatpush1.bf16.msra.mxu1 %v2361_v40  ;;  %1192 = vmatprep.mubr.bf16.mxu1 %v2748_v49  ;;  %v2418_v49 = vld [vmem:[#allocation5 + $0x3c8] ss:$16 sps:$4 sm:$0xff]  }
  0x93   :  { %1162 = vmatprep.subr.bf16.mxu1 %v2369_v41  ;;  %1215 = vmatprep.subr.bf16.mxu0 %v2408_v43  ;;  %v2451_v40 = vld [vmem:[#allocation5 + $0x108] ss:$16 sps:$4 sm:$0xff]   ;;  %v2127_v41 = vcombine.high %v247_v37, %v247_v37 }
  0x94   :  { %v2489_v43 = vld [vmem:[#allocation7 + $0x20] ss:$8 sps:$4 sm:$0xff]  }
  0x95   :  { %1216 = vmatpush1.bf16.msra.mxu0 %v2406_v46  ;;  %v2461_v46 = vld [vmem:[#allocation5 + $0x48c] ss:$16 sps:$4 sm:$0xff]   ;;  %v2561_v37 = vld [vmem:[#allocation7 + $0x1a0] ss:$8 sps:$4 sm:$0xff]  }
  0x96   :  { %1163 = vmatpush1.bf16.msra.mxu1 %v2367_v44  ;;  %1217 = vmatprep.subr.bf16.mxu0 %v2414_v47  ;;  %v2494_v44 = vld [vmem:[#allocation7 + $0x14] ss:$8 sps:$4 sm:$0xff]   ;;  %v2492_v47 = vld [vmem:[#allocation7 + $0x10] ss:$8 sps:$4 sm:$0xff]  }
  0x97   :  { %1164 = vmatprep.subr.bf16.mxu1 %v2375_v45  ;;  %v1032_v45 = vsel %vm1024_vm0, %v2126_v42, 0  ;;  %v2567_v42 = vld [vmem:[#allocation7 + $0x180] ss:$8 sps:$4 sm:$0xff]  }
  0x99   :  { %1218 = vmatpush2.bf16.msra.mxu0 %v2412_v51  ;;  %v2464_v51 = vld [vmem:[#allocation5 + $0x46c] ss:$16 sps:$4 sm:$0xff]  }
  0x9a   :  { %1165 = vmatpush1.bf16.msra.mxu1 %v2373_v48  ;;  %1219 = vmatprep.subr.bf16.mxu0 %v2420_v52  ;;  %v2497_v48 = vld [vmem:[#allocation7 + $0x4] ss:$8 sps:$4 sm:$0xff]   ;;  %v2495_v52 = vld [vmem:[#allocation7] ss:$8 sps:$4 sm:$0xff]  }
  0x9b   :  { %1166 = vmatprep.subr.bf16.mxu1 %v2381_v50  ;;  %v2459_v50 = vld [vmem:[#allocation5 + $0x488] ss:$16 sps:$4 sm:$0xff]  }
  0x9d   :  { %1220 = vmatpush2.bf16.msra.mxu0 %v2418_v49  ;;  %v2467_v49 = vld [vmem:[#allocation5 + $0x44c] ss:$16 sps:$4 sm:$0xff]  }
  0x9e   :  { %1167 = vmatpush1.bf16.msra.mxu1 %v2379_v53  ;;  %1221 = vmatprep.subr.bf16.mxu0 %v2426_v55  ;;  %v2500_v53 = vld [vmem:[#allocation7 + $0xf4] ss:$8 sps:$4 sm:$0xff]   ;;  %v2498_v55 = vld [vmem:[#allocation7 + $0xf0] ss:$8 sps:$4 sm:$0xff]  }
  0x9f   :  { %1168 = vmatprep.subr.bf16.mxu1 %v2387_v54  ;;  %v2462_v54 = vld [vmem:[#allocation5 + $0x468] ss:$16 sps:$4 sm:$0xff]  }
  0xa1   :  { %1222 = vmatpush2.bf16.msra.mxu0 %v2424_v58  ;;  %v2506_v58 = vld [vmem:[#allocation7 + $0xd4] ss:$8 sps:$4 sm:$0xff]  }
  0xa2   :  { %1169 = vmatpush1.bf16.msra.mxu1 %v2385_v56  ;;  %1223 = vmatprep.subr.bf16.mxu0 %v2432_v59  ;;  %v2503_v56 = vld [vmem:[#allocation7 + $0xe4] ss:$8 sps:$4 sm:$0xff]   ;;  %v2468_v59 = vld [vmem:[#allocation5 + $0x428] ss:$16 sps:$4 sm:$0xff]  }
  0xa3   :  { %1170 = vmatprep.subr.bf16.mxu1 %v2393_v57  ;;  %v2470_v57 = vld [vmem:[#allocation5 + $0x42c] ss:$16 sps:$4 sm:$0xff]  }
  0xa5   :  { %1224 = vmatpush2.bf16.msra.mxu0 %v2430_v62  ;;  %v2509_v62 = vld [vmem:[#allocation7 + $0xc4] ss:$8 sps:$4 sm:$0xff]  }
  0xa6   :  { %1171 = vmatpush1.bf16.msra.mxu1 %v2391_v60  ;;  %1225 = vmatprep.subr.bf16.mxu0 %v2438_v63  ;;  %v2473_v60 = vld [vmem:[#allocation5 + $0x40c] ss:$16 sps:$4 sm:$0xff]   ;;  %v2471_v63 = vld [vmem:[#allocation5 + $0x408] ss:$16 sps:$4 sm:$0xff]  }
  0xa7   :  { %1172 = vmatprep.subr.bf16.mxu1 %v2399_v61  ;;  %v2504_v61 = vld [vmem:[#allocation7 + $0xd0] ss:$8 sps:$4 sm:$0xff]  }
  0xa9   :  { %1226 = vmatpush2.bf16.msra.mxu0 %v2436_v2  ;;  %v2512_v2 = vld [vmem:[#allocation7 + $0xb4] ss:$8 sps:$4 sm:$0xff]  }
  0xaa   :  { %1173 = vmatpush1.bf16.msra.mxu1 %v2397_v0  ;;  %1227 = vmatprep.subr.bf16.mxu0 %v2444_v3  ;;  %v2507_v0 = vld [vmem:[#allocation7 + $0xc0] ss:$8 sps:$4 sm:$0xff]   ;;  %v2522_v3 = vld [vmem:[#allocation7 + $0x170] ss:$8 sps:$4 sm:$0xff]  }
  0xab   :  { %1174 = vmatprep.subr.bf16.mxu1 %v2405_v1  ;;  %v2524_v1 = vld [vmem:[#allocation7 + $0x174] ss:$8 sps:$4 sm:$0xff]  }
  0xad   :  { %1228 = vmatpush2.bf16.msra.mxu0 %v2442_v6  ;;  %v2515_v6 = vld [vmem:[#allocation7 + $0xa4] ss:$8 sps:$4 sm:$0xff]  }
  0xae   :  { %1175 = vmatpush1.bf16.msra.mxu1 %v2403_v4  ;;  %1229 = vmatprep.subr.bf16.mxu0 %v2450_v7  ;;  %v2510_v4 = vld [vmem:[#allocation7 + $0xb0] ss:$8 sps:$4 sm:$0xff]   ;;  %v2525_v7 = vld [vmem:[#allocation7 + $0x160] ss:$8 sps:$4 sm:$0xff]  }
  0xaf   :  { %1176 = vmatprep.subr.bf16.mxu1 %v2411_v5  ;;  %v2527_v5 = vld [vmem:[#allocation7 + $0x164] ss:$8 sps:$4 sm:$0xff]  }
  0xb1   :  { %1230 = vmatpush2.bf16.msra.mxu0 %v2448_v10  ;;  %v2518_v10 = vld [vmem:[#allocation7 + $0x94] ss:$8 sps:$4 sm:$0xff]  }
  0xb2   :  { %1177 = vmatpush2.bf16.msra.mxu1 %v2409_v8  ;;  %1231 = vmatprep.subr.bf16.mxu0 %v2456_v13  ;;  %v2513_v8 = vld [vmem:[#allocation7 + $0xa0] ss:$8 sps:$4 sm:$0xff]   ;;  %v2528_v13 = vld [vmem:[#allocation7 + $0x150] ss:$8 sps:$4 sm:$0xff]  }
  0xb3   :  { %1178 = vmatprep.subr.bf16.mxu1 %v2417_v9  ;;  %v2530_v9 = vld [vmem:[#allocation7 + $0x154] ss:$8 sps:$4 sm:$0xff]  }
  0xb5   :  { %1232 = vmatpush2.bf16.msra.mxu0 %v2454_v16  ;;  %v2521_v16 = vld [vmem:[#allocation7 + $0x84] ss:$8 sps:$4 sm:$0xff]  }
  0xb6   :  { %1179 = vmatpush2.bf16.msra.mxu1 %v2415_v14  ;;  %1687 = vmatprep.subr.bf16.mxu0 %v2476_v17  ;;  %v2516_v14 = vld [vmem:[#allocation7 + $0x90] ss:$8 sps:$4 sm:$0xff]   ;;  %v2531_v17 = vld [vmem:[#allocation7 + $0x140] ss:$8 sps:$4 sm:$0xff]  }
  0xb7   :  { %1180 = vmatprep.subr.bf16.mxu1 %v2423_v15  ;;  %v2533_v15 = vld [vmem:[#allocation7 + $0x144] ss:$8 sps:$4 sm:$0xff]  }
  0xb8   :  { %1234 = vmatmul.mubr.bf16.vlgmr.msra.gmra.mxu0 %v2756_v12  ;;  %v2445_v12 = vld [vmem:[#allocation5 + $0x128] ss:$16 sps:$4 sm:$0xff]  }
  0xb9   :  { %1688 = vmatpush1.bf16.msra.mxu0 %v2474_v21  ;;  %v2539_v21 = vld [vmem:[#allocation7 + $0x124] ss:$8 sps:$4 sm:$0xff]  }
  0xba   :  { %1181 = vmatpush2.bf16.msra.mxu1 %v2421_v19  ;;  %1689 = vmatprep.subr.bf16.mxu0 %v2479_v23  ;;  %v2536_v19 = vld [vmem:[#allocation7 + $0x134] ss:$8 sps:$4 sm:$0xff]  }
  0xbb   :  { %1182 = vmatprep.subr.bf16.mxu1 %v2429_v20  ;;  %v2534_v20 = vld [vmem:[#allocation7 + $0x130] ss:$8 sps:$4 sm:$0xff]   ;;  %v2542_v23 = vld [vmem:[#allocation7 + $0x114] ss:$8 sps:$4 sm:$0xff]  }
  0xbd   :  { %1690 = vmatpush1.bf16.msra.mxu0 %v2477_v25  ;;  %v2545_v25 = vld [vmem:[#allocation7 + $0x104] ss:$8 sps:$4 sm:$0xff]  }
  0xbe   :  { %1183 = vmatpush2.bf16.msra.mxu1 %v2427_v22  ;;  %1691 = vmatprep.subr.bf16.mxu0 %v2482_v26  ;;  %v2537_v22 = vld [vmem:[#allocation7 + $0x120] ss:$8 sps:$4 sm:$0xff]  }
  0xbf   :  { %1184 = vmatprep.subr.bf16.mxu1 %v2435_v24  ;;  %v2540_v24 = vld [vmem:[#allocation7 + $0x110] ss:$8 sps:$4 sm:$0xff]   ;;  %v2543_v26 = vld [vmem:[#allocation7 + $0x100] ss:$8 sps:$4 sm:$0xff]  }
  0xc1   :  { %1692 = vmatpush1.bf16.msra.mxu0 %v2480_v29  ;;  %v2551_v29 = vld [vmem:[#allocation7 + $0x1e4] ss:$8 sps:$4 sm:$0xff]  }
  0xc2   :  { %1185 = vmatpush2.bf16.msra.mxu1 %v2433_v27  ;;  %1693 = vmatprep.subr.bf16.mxu0 %v2485_v31  ;;  %v2548_v27 = vld [vmem:[#allocation7 + $0x1f4] ss:$8 sps:$4 sm:$0xff]  }
  0xc3   :  { %1186 = vmatprep.subr.bf16.mxu1 %v2441_v28  ;;  %v2546_v28 = vld [vmem:[#allocation7 + $0x1f0] ss:$8 sps:$4 sm:$0xff]   ;;  %v2554_v31 = vld [vmem:[#allocation7 + $0x1d4] ss:$8 sps:$4 sm:$0xff]  }
  0xc5   :  { %1694 = vmatpush1.bf16.msra.mxu0 %v2483_v33  ;;  %v2557_v33 = vld [vmem:[#allocation7 + $0x1c4] ss:$8 sps:$4 sm:$0xff]  }
  0xc6   :  { %1187 = vmatpush2.bf16.msra.mxu1 %v2439_v30  ;;  %1695 = vmatprep.subr.bf16.mxu0 %v2488_v34  ;;  %v2549_v30 = vld [vmem:[#allocation7 + $0x1e0] ss:$8 sps:$4 sm:$0xff]  }
  0xc7   :  { %1188 = vmatprep.subr.bf16.mxu1 %v2447_v32  ;;  %v2552_v32 = vld [vmem:[#allocation7 + $0x1d0] ss:$8 sps:$4 sm:$0xff]   ;;  %v2555_v34 = vld [vmem:[#allocation7 + $0x1c0] ss:$8 sps:$4 sm:$0xff]  }
  0xc9   :  { %1696 = vmatpush1.bf16.msra.mxu0 %v2486_v36  ;;  %v2563_v36 = vld [vmem:[#allocation7 + $0x1a4] ss:$8 sps:$4 sm:$0xff]  }
  0xca   :  { %1189 = vmatpush2.bf16.msra.mxu1 %v2445_v12  ;;  %1697 = vmatprep.subr.bf16.mxu0 %v2491_v38  ;;  %v2560_v12 = vld [vmem:[#allocation7 + $0x1b4] ss:$8 sps:$4 sm:$0xff]  }
  0xcb   :  { %1190 = vmatprep.subr.bf16.mxu1 %v2453_v35  ;;  %v2558_v35 = vld [vmem:[#allocation7 + $0x1b0] ss:$8 sps:$4 sm:$0xff]   ;;  %v2566_v38 = vld [vmem:[#allocation7 + $0x194] ss:$8 sps:$4 sm:$0xff]  }
  0xcd   :  { %1698 = vmatpush1.bf16.msra.mxu0 %v2489_v43 }
  0xce   :  { %1191 = vmatpush2.bf16.msra.mxu1 %v2451_v40  ;;  %1699 = vmatprep.subr.bf16.mxu0 %v2494_v44  ;;  %v2564_v40 = vld [vmem:[#allocation7 + $0x190] ss:$8 sps:$4 sm:$0xff]  }
  0xcf   :  { %2130 = vmatprep.subr.msk.bf16.mxu1 %vm1024_vm0, %v2127_v41  ;;  %v2569_v41 = vld [vmem:[#allocation7 + $0x184] ss:$8 sps:$4 sm:$0xff]  }
  0xd1   :  { %1193 = vmatmul.mubr.bf16.vlgmr.msra.gmra.mxu1 %v2754_v11  ;;  %1700 = vmatpush1.bf16.msra.mxu0 %v2492_v47  ;;  %v2465_v11 = vld [vmem:[#allocation5 + $0x448] ss:$16 sps:$4 sm:$0xff]   ;;  %v250_v47 = vlaneseq }
  0xd2   :  { %1247 = vmatpush1.bf16.msra.mxu1 %v1032_v45  ;;  %1274 = vmatprep.mubr.bf16.mxu1 %v2682_v18  ;;  %v2501_v18 = vld [vmem:[#allocation7 + $0xe0] ss:$8 sps:$4 sm:$0xff]  }
  0xd3   :  { %1248 = vmatprep.subr.bf16.mxu1 %v2461_v46  ;;  %1701 = vmatprep.subr.bf16.mxu0 %v2497_v48 }
  0xd5   :  { %1702 = vmatpush1.bf16.msra.mxu0 %v2495_v52 }
  0xd6   :  { %1249 = vmatpush1.bf16.msra.mxu1 %v2459_v50  ;;  %1703 = vmatprep.subr.bf16.mxu0 %v2500_v53  ;;  %v2776_v53 = vshrl.u32 %v250_v47, 7  ;;  %v2583_v47 = vld [vmem:[#allocation8 + $0x8] sm:$0xff]  }
  0xd7   :  { %1250 = vmatprep.subr.bf16.mxu1 %v2464_v51 }
  0xd9   :  { %1704 = vmatpush2.bf16.msra.mxu0 %v2498_v55  ;;  %v256_v55 = vsub.s32 1, %v2776_v53 }
  0xda   :  { %1251 = vmatpush1.bf16.msra.mxu1 %v2462_v54  ;;  %1705 = vmatprep.subr.bf16.mxu0 %v2503_v56  ;;  %v252_v54 = vsub.s32 0, %v2776_v53 }
  0xdb   :  { %1252 = vmatprep.subr.bf16.mxu1 %v2467_v49  ;;  %v248_v49 = vld [vmem:[%s2807_s2] sm:$0xf] }
  0xdc   :  { %v253_v56 = vrot.slane %v248_v49, %v252_v54 }
  0xdd   :  { %1706 = vmatpush2.bf16.msra.mxu0 %v2501_v18 }
  0xde   :  { %1253 = vmatpush1.bf16.msra.mxu1 %v2465_v11  ;;  %1707 = vmatprep.subr.bf16.mxu0 %v2506_v58  ;;  %v257_v11 = vrot.slane %v248_v49, %v256_v55 }
  0xdf   :  { %1254 = vmatprep.subr.bf16.mxu1 %v2470_v57 }
  0xe1   :  { %1708 = vmatpush2.bf16.msra.mxu0 %v2504_v61 }
  0xe2   :  { %1255 = vmatpush1.bf16.msra.mxu1 %v2468_v59  ;;  %1709 = vmatprep.subr.bf16.mxu0 %v2509_v62 }
  0xe3   :  { %1256 = vmatprep.subr.bf16.mxu1 %v2473_v60 }
  0xe5   :  { %1710 = vmatpush2.bf16.msra.mxu0 %v2507_v0 }
  0xe6   :  { %1257 = vmatpush1.bf16.msra.mxu1 %v2471_v63  ;;  %1711 = vmatprep.subr.bf16.mxu0 %v2512_v2 }
  0xe7   :  { %1728 = vmatprep.subr.bf16.mxu1 %v2524_v1 }
  0xe9   :  { %2131 = vmatmul.mubr.msk.bf16.vlgmr.msra.gmra.mxu1 %vm1020_vm1, %v2764_v39  ;;  %1712 = vmatpush2.bf16.msra.mxu0 %v2510_v4  ;;  %v2519_v39 = vld [vmem:[#allocation7 + $0x80] ss:$8 sps:$4 sm:$0xff]  }
  0xea   :  { %1729 = vmatpush1.bf16.msra.mxu1 %v2522_v3  ;;  %1713 = vmatprep.subr.bf16.mxu0 %v2515_v6 }
  0xeb   :  { %1730 = vmatprep.subr.bf16.mxu1 %v2527_v5 }
  0xed   :  { %1714 = vmatpush2.bf16.msra.mxu0 %v2513_v8 }
  0xee   :  { %1731 = vmatpush1.bf16.msra.mxu1 %v2525_v7  ;;  %1715 = vmatprep.subr.bf16.mxu0 %v2518_v10 }
  0xef   :  { %1732 = vmatprep.subr.bf16.mxu1 %v2530_v9 }
  0xf1   :  { %1716 = vmatpush2.bf16.msra.mxu0 %v2516_v14 }
  0xf2   :  { %1733 = vmatpush1.bf16.msra.mxu1 %v2528_v13  ;;  %1717 = vmatprep.subr.bf16.mxu0 %v2521_v16  ;;  %v260_v16 = vsub.s32 2, %v2776_v53 }
  0xf3   :  { %1734 = vmatprep.subr.bf16.mxu1 %v2533_v15 }
  0xf5   :  { %1718 = vmatpush2.bf16.msra.mxu0 %v2519_v39  ;;  %v261_v39 = vrot.slane %v248_v49, %v260_v16 }
  0xf6   :  { %1735 = vmatpush1.bf16.msra.mxu1 %v2531_v17  ;;  %v264_v17 = vsub.s32 3, %v2776_v53  ;;  %v2196_v53 = vld [vmem:[%s2811_s6] ss:$0 sm:$0xff] }
  0xf7   :  { %1736 = vmatprep.subr.bf16.mxu1 %v2536_v19  ;;  %v2570_v19 = vld [vmem:[#allocation8 + $0x78] sm:$0xff]  }
  0xf8   :  { %2215 = vmatprep.subr.bf16.mxu0 %v2570_v19 }
  0xfa   :  { %1737 = vmatpush1.bf16.msra.mxu1 %v2534_v20  ;;  %v2571_v20 = vld [vmem:[#allocation8 + $0x38] sm:$0xff]  }
  0xfb   :  { %1738 = vmatprep.subr.bf16.mxu1 %v2539_v21  ;;  %v2572_v21 = vld [vmem:[#allocation8 + $0x70] sm:$0xff]  }
  0xfe   :  { %1739 = vmatpush1.bf16.msra.mxu1 %v2537_v22  ;;  %v265_v22 = vrot.slane %v248_v49, %v264_v17 }
  0xff   :  { %1740 = vmatprep.subr.bf16.mxu1 %v2542_v23 }
 0x102   :  { %1741 = vmatpush1.bf16.msra.mxu1 %v2540_v24  ;;  %v2573_v24 = vld [vmem:[#allocation8 + $0x30] sm:$0xff]  }
 0x103   :  { %1742 = vmatprep.subr.bf16.mxu1 %v2545_v25  ;;  %v2574_v25 = vld [vmem:[#allocation8 + $0x68] sm:$0xff]  }
 0x106   :  { %1743 = vmatpush1.bf16.msra.mxu1 %v2543_v26 }
 0x107   :  { %1744 = vmatprep.subr.bf16.mxu1 %v2548_v27 }
 0x10a   :  { %1745 = vmatpush2.bf16.msra.mxu1 %v2546_v28  ;;  %v2575_v28 = vld [vmem:[#allocation8 + $0x28] sm:$0xff]  }
 0x10b   :  { %1746 = vmatprep.subr.bf16.mxu1 %v2551_v29 }
 0x10e   :  { %1747 = vmatpush2.bf16.msra.mxu1 %v2549_v30  ;;  %v2576_v30 = vld [vmem:[#allocation8 + $0x60] sm:$0xff]  }
 0x10f   :  { %1748 = vmatprep.subr.bf16.mxu1 %v2554_v31 }
 0x112   :  { %1749 = vmatpush2.bf16.msra.mxu1 %v2552_v32 }
 0x113   :  { %1750 = vmatprep.subr.bf16.mxu1 %v2557_v33 }
 0x116   :  { %1751 = vmatpush2.bf16.msra.mxu1 %v2555_v34 }
 0x117   :  { %1752 = vmatprep.subr.bf16.mxu1 %v2560_v12  ;;  %v2577_v12 = vld [vmem:[#allocation8 + $0x20] sm:$0xff]  }
 0x11a   :  { %1753 = vmatpush2.bf16.msra.mxu1 %v2558_v35 }
 0x11b   :  { %1754 = vmatprep.subr.bf16.mxu1 %v2563_v36 }
 0x11e   :  { %1755 = vmatpush2.bf16.msra.mxu1 %v2561_v37  ;;  %v2578_v37 = vld [vmem:[#allocation8 + $0x58] sm:$0xff]  }
 0x11f   :  { %1756 = vmatprep.subr.bf16.mxu1 %v2566_v38 }
 0x122   :  { %1757 = vmatpush2.bf16.msra.mxu1 %v2564_v40 }
 0x123   :  { %1758 = vmatprep.subr.bf16.mxu1 %v2569_v41 }
 0x126   :  { %1759 = vmatpush2.bf16.msra.mxu1 %v2567_v42  ;;  %v2579_v42 = vld [vmem:[#allocation8 + $0x18] sm:$0xff]  }
 0x138   :  { %v1071_v43 = vpop.f32.mrf.mxu0 }
 0x139   :  { %v1112_v44 = vpop.f32.mrf.mxu1  ;;  %v1072_v57 = vadd.f32 %v1071_v43, %v253_v56 }
 0x13a   :  { %v1073_v45 = vpop.f32.mrf.mxu0 }
 0x13b   :  { %v1114_v46 = vpop.f32.mrf.mxu1  ;;  %v1074_v18 = vadd.f32 %v1073_v45, %v257_v11  ;;  %v1113_v58 = vadd.f32 %v1112_v44, %v1072_v57  ;;  %v2580_v44 = vld [vmem:[#allocation8 + $0x50] sm:$0xff]   ;;  %v1355_v11 = vld [vmem:[%s2809_s4] sm:$0x3] }
 0x13c   :  { %v1075_v50 = vpop.f32.mrf.mxu0  ;;  %v2581_v45 = vld [vmem:[#allocation8 + $0x10] sm:$0xff]   ;;  %v1360_v57 = vrot.slane %v1355_v11, %v252_v54 }
 0x13d   :  { %v1116_v48 = vpop.f32.mrf.mxu1  ;;  %v1115_v60 = vadd.f32 %v1114_v46, %v1074_v18  ;;  %v2582_v46 = vld [vmem:[#allocation8 + $0x48] sm:$0xff]   ;;  %v2585_v50 = vld [vmem:[#allocation8] sm:$0xff]   ;;  %v1364_v18 = vrot.slane %v1355_v11, %v256_v55 }
 0x13e   :  { %v1076_v52 = vpop.f32.mrf.mxu0  ;;  %v2584_v48 = vld [vmem:[#allocation8 + $0x40] sm:$0xff]  }
 0x13f   :  { %v1117_v51 = vpop.f32.mrf.mxu1 }
 0x151   :  { %v1153_v59 = vpop.f32.mrf.mxu1 }
 0x152   :  { %v1154_v61 = vadd.f32 %v1153_v59, %v1113_v58 }
 0x153   :  { %v1155_v62 = vpop.f32.mrf.mxu1 }
 0x154   :  { %v1156_v63 = vadd.f32 %v1155_v62, %v1115_v60  ;;  %v1283_v0 = vmax.f32 %v1154_v61, 0.0 }
 0x155   :  { %v1157_v1 = vpop.f32.mrf.mxu1 }
 0x156   :  { %v1284_v2 = vmax.f32 %v1156_v63, 0.0  ;;  %v1287_v5 = vpack.c.bf16 %v1283_v0, %v1283_v0 }
 0x157   :  { %v1158_v3 = vpop.f32.mrf.mxu1 }
 0x158   :  { %v1288_v4 = vpack.c.bf16 %v1284_v2, %v1284_v2 }
 0x15a   :  { %1719 = vmatprep.mubr.bf16.mxu0 %v1288_v4 }
 0x15b   :  { %1720 = vmatmul.mubr.bf16.vlgmr.msra.gmra.mxu0 %v1287_v5 }
 0x15c   :  { %2216 = vmatpush3.bf16.msra.mxu0 %v2571_v20 }
 0x15d   :  { %2217 = vmatprep.subr.bf16.mxu0 %v2572_v21 }
 0x160   :  { %2218 = vmatpush3.bf16.msra.mxu0 %v2573_v24 }
 0x161   :  { %2219 = vmatprep.subr.bf16.mxu0 %v2574_v25 }
 0x164   :  { %2220 = vmatpush3.bf16.msra.mxu0 %v2575_v28 }
 0x165   :  { %2221 = vmatprep.subr.bf16.mxu0 %v2576_v30 }
 0x168   :  { %2222 = vmatpush3.bf16.msra.mxu0 %v2577_v12 }
 0x169   :  { %2223 = vmatprep.subr.bf16.mxu0 %v2578_v37 }
 0x16c   :  { %2224 = vmatpush3.bf16.msra.mxu0 %v2579_v42 }
 0x16d   :  { %2225 = vmatprep.subr.bf16.mxu0 %v2580_v44 }
 0x170   :  { %2226 = vmatpush3.bf16.msra.mxu0 %v2581_v45 }
 0x171   :  { %2227 = vmatprep.subr.bf16.mxu0 %v2582_v46 }
 0x174   :  { %2228 = vmatpush3.bf16.msra.mxu0 %v2583_v47 }
 0x175   :  { %2229 = vmatprep.subr.bf16.mxu0 %v2584_v48 }
 0x178   :  { %v1235_v6 = vpop.f32.mrf.mxu0  ;;  %2230 = vmatpush3.bf16.msra.mxu0 %v2585_v50 }
 0x17a   :  { %v1237_v7 = vpop.f32.mrf.mxu0 }
 0x17c   :  { %v1239_v8 = vpop.f32.mrf.mxu0 }
 0x17e   :  { %v1240_v9 = vpop.f32.mrf.mxu0 }
 0x191   :  { %v1194_v10 = vpop.f32.mrf.mxu1 }
 0x192   :  { %v1195_v23 = vadd.f32 %v1194_v10, %v261_v39  ;;  %v2213_v10 = vld [vmem:[%s2812_s7] ss:$0 sm:$0xff] }
 0x193   :  { %v1196_v13 = vpop.f32.mrf.mxu1 }
 0x194   :  { %v1197_v26 = vadd.f32 %v1196_v13, %v265_v22  ;;  %v1236_v27 = vadd.f32 %v1235_v6, %v1195_v23 }
 0x195   :  { %v1198_v14 = vpop.f32.mrf.mxu1 }
 0x196   :  { %v1238_v31 = vadd.f32 %v1237_v7, %v1197_v26 }
 0x197   :  { %v1199_v15 = vpop.f32.mrf.mxu1 }
 0x198   :  { %v2214_v15 = vld [vmem:[#allocation2] ss:$0 sm:$0xff] }
 0x1a9   :  { %v1276_v29 = vpop.f32.mrf.mxu1 }
 0x1aa   :  { %v1277_v32 = vadd.f32 %v1276_v29, %v1236_v27 }
 0x1ab   :  { %v1278_v33 = vpop.f32.mrf.mxu1 }
 0x1ac   :  { %v1279_v34 = vadd.f32 %v1278_v33, %v1238_v31  ;;  %v1285_v35 = vmax.f32 %v1277_v32, 0.0 }
 0x1ad   :  { %v1280_v36 = vpop.f32.mrf.mxu1 }
 0x1ae   :  { %v1286_v38 = vmax.f32 %v1279_v34, 0.0  ;;  %v1289_v43 = vpack.c.bf16 %v1285_v35, %v1285_v35 }
 0x1af   :  { %v1281_v40 = vpop.f32.mrf.mxu1 }
 0x1b0   :  { %v1290_v41 = vpack.c.bf16 %v1286_v38, %v1286_v38 }
 0x1b2   :  { %1760 = vmatprep.mubr.bf16.mxu1 %v1290_v41 }
 0x1b3   :  { %1761 = vmatmul.mubr.bf16.vlgmr.msra.gmra.mxu1 %v1289_v43 }
 0x21b   :  { %v1721_v51 = vpop.f32.mrf.mxu0 }
 0x21c   :  { %v1722_v58 = vadd.f32 %v1721_v51, %v1360_v57 }
 0x21d   :  { %v1723_v52 = vpop.f32.mrf.mxu0 }
 0x21e   :  { %v1724_v60 = vadd.f32 %v1723_v52, %v1364_v18 }
 0x21f   :  { %v1725_v49 = vpop.f32.mrf.mxu0 }
 0x221   :  { %v1726_v56 = vpop.f32.mrf.mxu0 }
 0x273   :  { %v1762_v59 = vpop.f32.mrf.mxu1 }
 0x274   :  { %v1763_v61 = vadd.f32 %v1762_v59, %v1722_v58 }
 0x275   :  { %v1764_v62 = vpop.f32.mrf.mxu1 }
 0x276   :  { %v1765_v63 = vadd.f32 %v1764_v62, %v1724_v60  ;;  %v1769_v0 = vmax.f32 %v1763_v61, 0.0 }
 0x277   :  { %v1766_v1 = vpop.f32.mrf.mxu1 }
 0x278   :  { %v1770_v2 = vmax.f32 %v1765_v63, 0.0  ;;  %v1771_v5 = vpack.c.bf16 %v1769_v0, %v1769_v0 }
 0x279   :  { %v1767_v3 = vpop.f32.mrf.mxu1 }
 0x27a   :  { %v1772_v4 = vpack.c.bf16 %v1770_v2, %v1770_v2 }
 0x27c   :  { %1940 = vmatprep.mubr.bf16.mxu0 %v1772_v4 }
 0x27d   :  { %1941 = vmatmul.mubr.bf16.vlgmr.msra.gmra.mxu0 %v1771_v5 }
 0x33d   :  { %v2231_v6 = vpop.f32.mrf.mxu0 }
 0x33f   :  { %v2232_v7 = vpop.f32.mrf.mxu0 }
 0x340   :  { %v2233_v54 = vadd.f32 %v2232_v7, %v2231_v6 }
 0x341   :  { %v2234_v55 = vpop.f32.mrf.mxu0 }
 0x342   :  { %v1943_v8 = vadd.f32 %v2233_v54, %v2196_v53 }
 0x343   :  { %v2235_v9 = vpop.f32.mrf.mxu0 }
 0x344   :  { %v1948_v13 = vmax.f32 %v1943_v8, 0.0 }
 0x346   :  { %v1956_v14 = vmul.f32 %v2213_v10, %v1948_v13 }
 0x348   :  { %1957 = vadd.xlane.f32.xlu0 %v1956_v14 }
 0x3d1   :  { %v1958_v16 = vpop.xlane.xlu0 %1957 }
 0x3d2   :  { %v1966_v17 = vadd.f32 %v2214_v15, %v1958_v16 }
 0x3d4   :  { %1968 = vst.msk [vmem:[%s2814_s9] sm:$0xff] %vm1967_vm2, %v1966_v17 }
 0x3d5   :  { %1973 = vsyncpa [#allocation4], 1 }
 0x3d6   :  { %1974 = vsyncpa [#allocation6], 1 }
 0x3d7   :  { %1975 = vsyncpa [#allocation9], 1 }

</bundles_post_ra>
